<compile_context>
chip_gen: v6e
topology: v6e:2x2x1
jax: 0.10.0
libtpu: 0.0.40
codegen_flags: <defaults>
</compile_context>

<pallas_src>
import jax
import jax.numpy as jnp
from jax.experimental import pallas as pl
from jax.experimental.pallas import tpu as pltpu


def _srnn_recurrent_kernel(xproj_ref, whT_ref, out_ref, h_scratch):
    # xproj_ref: (TT, TB, Hp) f32 -- precomputed x @ Wx^T + b for this block
    # whT_ref:   (Hp, Hp)         -- resident recurrent weight (pre-transposed)
    # out_ref:   (TT, TB, Hp) f32
    # h_scratch: (TB, Hp) f32     -- hidden state carried across the time axis

    # Initialize the hidden state at the start of each batch block's time sweep.
    @pl.when(pl.program_id(1) == 0)
    def _():
        h_scratch[...] = jnp.zeros_like(h_scratch)

    whT = whT_ref[...]
    h = h_scratch[...]

    # Static, fully-unrolled time loop (TT is a compile-time block size);
    # equivalent straight-line codegen to lax.fori_loop(..., unroll=True).
    for t in range(xproj_ref.shape[0]):
        rec = jnp.dot(h.astype(whT.dtype), whT,
                      preferred_element_type=jnp.float32)          # (TB, Hp)
        h = jnp.tanh(xproj_ref[t] + rec)                            # f32 tanh
        out_ref[t] = h.astype(out_ref.dtype)

    h_scratch[...] = h


def _round_up(n, m):
    return ((n + m - 1) // m) * m


def srnn_forward(x, wx_weight, wx_bias, wh_weight, *,
                 time_block=16, compute_dtype=jnp.float32):
    """SRNN forward (eval mode).

    Args:
      x:         (B, T, I) float32
      wx_weight: (H, I)  -- nn.Linear(input_size, hidden_size).weight
      wx_bias:   (H,)    -- nn.Linear bias
      wh_weight: (H, H)  -- nn.Linear(hidden_size, hidden_size, bias=False).weight

    Returns:
      outputs: (B, T, H) float32
      h_last:  (B, H)    float32
    """
    B, T, I = x.shape
    H = wx_weight.shape[0]

    x = jnp.asarray(x, jnp.float32)
    wxT = jnp.asarray(wx_weight, jnp.float32).T            # (I, H)
    bias = jnp.asarray(wx_bias, jnp.float32)               # (H,)
    whT = jnp.asarray(wh_weight, jnp.float32).T            # (H, H)

    # Hardware-friendly padded sizes: sublane multiple of 8 for batch,
    # lane multiple of 128 for hidden, time multiple of the time block.
    TB = 256 if B > 256 else _round_up(B, 8)               # batch tile
    Bp = _round_up(B, TB)
    Hp = _round_up(H, 128)
    TT = min(time_block, T)                                # time steps / block
    Tp = _round_up(T, TT)

    # Zero-pad weights / bias along H.  Zero padding is inert: padded hidden
    # columns stay exactly 0 through the recurrence (tanh(0) = 0) and padded
    # Wh^T rows contribute nothing to the real columns.
    wxT_p = jnp.pad(wxT, ((0, 0), (0, Hp - H)))
    bias_p = jnp.pad(bias, (0, Hp - H))
    whT_p = jnp.pad(whT, ((0, Hp - H), (0, Hp - H))).astype(compute_dtype)

    # Hoisted input projection: one large MXU matmul with no serial dependency.
    xproj = jnp.einsum("bti,ih->bth", x, wxT_p) + bias_p    # (B, T, Hp)
    xproj = jnp.transpose(xproj, (1, 0, 2))                 # (T, B, Hp)
    xproj = jnp.pad(xproj, ((0, Tp - T), (0, Bp - B), (0, 0)))

    grid = (Bp // TB, Tp // TT)

    out_tbh = pl.pallas_call(
        _srnn_recurrent_kernel,
        out_shape=jax.ShapeDtypeStruct((Tp, Bp, Hp), jnp.float32),
        grid_spec=pltpu.PrefetchScalarGridSpec(
            num_scalar_prefetch=0,
            grid=grid,
            in_specs=[
                # Per-block activations (time-blocked, lane-dense in Hp).
                pl.BlockSpec((TT, TB, Hp), lambda b, t: (t, b, 0)),
                # Resident recurrent weight (constant index_map).  For very
                # large H on v7x (64 MiB VMEM), pass compute_dtype=bf16 (and
                # consider single-buffering / tiling Hp) to cut residency.
                pl.BlockSpec((Hp, Hp), lambda b, t: (0, 0)),
            ],
            out_specs=pl.BlockSpec((TT, TB, Hp), lambda b, t: (t, b, 0)),
            scratch_shapes=[pltpu.VMEM((TB, Hp), jnp.float32)],   # carried h_t
        ),
        compiler_params=pltpu.CompilerParams(
            # Batch blocks are independent recurrences (megacore-shardable);
            # time is the serial recurrence axis.
            dimension_semantics=("parallel", "arbitrary"),
        ),
    )(xproj, whT_p)

    outputs = jnp.transpose(out_tbh, (1, 0, 2))[:B, :T, :H]   # (B, T, H)
    h_last = outputs[:, -1, :]
    return outputs, h_last


def _srnn_reference(x, wx_weight, wx_bias, wh_weight):
    """Pure-JAX reference matching the PyTorch forward (eval mode)."""
    B, T, _ = x.shape
    H = wx_weight.shape[0]
    h = jnp.zeros((B, H), jnp.float32)
    outs = []
    for t in range(T):
        wx_out = x[:, t, :] @ wx_weight.T + wx_bias
        wh_out = h @ wh_weight.T
        h = jnp.tanh(wx_out + wh_out)
        outs.append(h[:, None, :])
    return jnp.concatenate(outs, axis=1), h


if __name__ == "__main__":
    B, T, I, H = 2, 8, 16, 32

    key = jax.random.PRNGKey(0)
    k_x, k_wx, k_bx, k_wh = jax.random.split(key, 4)

    # Deterministic parameter init (uniform +-1/sqrt(fan_in), like nn.Linear).
    x = jax.random.normal(k_x, (B, T, I), jnp.float32)
    wx_weight = jax.random.uniform(k_wx, (H, I), jnp.float32,
                                   minval=-1.0 / jnp.sqrt(I), maxval=1.0 / jnp.sqrt(I))
    wx_bias = jax.random.uniform(k_bx, (H,), jnp.float32,
                                 minval=-1.0 / jnp.sqrt(I), maxval=1.0 / jnp.sqrt(I))
    wh_weight = jax.random.uniform(k_wh, (H, H), jnp.float32,
                                   minval=-1.0 / jnp.sqrt(H), maxval=1.0 / jnp.sqrt(H))

    outputs, h_last = srnn_forward(x, wx_weight, wx_bias, wh_weight)
    jax.block_until_ready((outputs, h_last))

    ref_out, ref_h = _srnn_reference(x, wx_weight, wx_bias, wh_weight)
    assert outputs.shape == (B, T, H) and h_last.shape == (B, H)
    assert jnp.allclose(outputs, ref_out, atol=1e-4, rtol=1e-4)
    assert jnp.allclose(h_last, ref_h, atol=1e-4, rtol=1e-4)

    print("KERNEL_OK")
</pallas_src>

<mosaic_0001>
module attributes {stable_mosaic.version = 11 : i64} {
  func.func @_srnn_recurrent_kernel(%arg0: i32, %arg1: i32, %arg2: memref<8x8x128xf32, #tpu.memory_space<vmem>>, %arg3: memref<128x128xf32, #tpu.memory_space<vmem>>, %arg4: memref<8x8x128xf32, #tpu.memory_space<vmem>>, %arg5: memref<8x128xf32, #tpu.memory_space<vmem>>) attributes {dimension_semantics = [#tpu.dimension_semantics<parallel>, #tpu.dimension_semantics<arbitrary>], iteration_bounds = array<i64: 1, 1>, scalar_prefetch = 0 : i64, scratch_operands = 1 : i64, tpu.core_type = #tpu.core_type<tc>, window_params = [{transform_indices = @transform_0, window_bounds = array<i64: 8, 8, 128>}, {pipeline_mode = #tpu.pipeline_mode<synchronous>, transform_indices = @transform_1, window_bounds = array<i64: 128, 128>}, {transform_indices = @transform_2, window_bounds = array<i64: 8, 8, 128>}]} {
    %c0_i32 = arith.constant 0 : i32
    %0 = arith.cmpi eq, %arg1, %c0_i32 : i32
    %1 = arith.extui %0 : i1 to i32
    %c0_i32_0 = arith.constant 0 : i32
    %2 = arith.cmpi ne, %1, %c0_i32_0 : i32
    scf.if %2 {
      %cst_54 = arith.constant 0.000000e+00 : f32
      %70 = vector.broadcast %cst_54 : f32 to vector<8x128xf32>
      %c0_55 = arith.constant 0 : index
      %c0_56 = arith.constant 0 : index
      %71 = vector.load %arg5[%c0_55, %c0_56] : memref<8x128xf32, #tpu.memory_space<vmem>>, vector<8x128xf32>
      tpu.vector_store %arg5[%c0_55, %c0_56], %70 {strides = array<i32>} : memref<8x128xf32, #tpu.memory_space<vmem>>, vector<8x128xf32>,
    } else {
    }
    %c0 = arith.constant 0 : index
    %c0_1 = arith.constant 0 : index
    %3 = vector.load %arg3[%c0, %c0_1] : memref<128x128xf32, #tpu.memory_space<vmem>>, vector<128x128xf32>
    %c0_2 = arith.constant 0 : index
    %c0_3 = arith.constant 0 : index
    %4 = vector.load %arg5[%c0_2, %c0_3] : memref<8x128xf32, #tpu.memory_space<vmem>>, vector<8x128xf32>
    %cst = arith.constant dense<0.000000e+00> : vector<8x128xf32>
    %5 = tpu.matmul %4, %3, %cst {dimension_numbers = #tpu.dot_dimension_numbers<[1], [0], [0], [1], [0, 0, 1, 1], [], []>} : vector<8x128xf32>, vector<128x128xf32>, vector<8x128xf32> -> vector<8x128xf32>
    %c0_4 = arith.constant 0 : index
    %c0_5 = arith.constant 0 : index
    %c0_6 = arith.constant 0 : index
    %6 = vector.load %arg2[%c0_4, %c0_5, %c0_6] : memref<8x8x128xf32, #tpu.memory_space<vmem>>, vector<1x8x128xf32>
    %7 = vector.shape_cast %6 : vector<1x8x128xf32> to vector<8x128xf32>
    %8 = arith.addf %7, %5 : vector<8x128xf32>
    %9 = math.tanh %8 : vector<8x128xf32>
    %c0_7 = arith.constant 0 : index
    %c0_8 = arith.constant 0 : index
    %c0_9 = arith.constant 0 : index
    %10 = vector.load %arg4[%c0_7, %c0_8, %c0_9] : memref<8x8x128xf32, #tpu.memory_space<vmem>>, vector<1x8x128xf32>
    %11 = vector.shape_cast %10 : vector<1x8x128xf32> to vector<8x128xf32>
    %12 = vector.shape_cast %9 : vector<8x128xf32> to vector<1x8x128xf32>
    tpu.vector_store %arg4[%c0_7, %c0_8, %c0_9], %12 {strides = array<i32>} : memref<8x8x128xf32, #tpu.memory_space<vmem>>, vector<1x8x128xf32>,
    %cst_10 = arith.constant dense<0.000000e+00> : vector<8x128xf32>
    %13 = tpu.matmul %9, %3, %cst_10 {dimension_numbers = #tpu.dot_dimension_numbers<[1], [0], [0], [1], [0, 0, 1, 1], [], []>} : vector<8x128xf32>, vector<128x128xf32>, vector<8x128xf32> -> vector<8x128xf32>
    %c1 = arith.constant 1 : index
    %c0_11 = arith.constant 0 : index
    %c0_12 = arith.constant 0 : index
    %14 = vector.load %arg2[%c1, %c0_11, %c0_12] : memref<8x8x128xf32, #tpu.memory_space<vmem>>, vector<1x8x128xf32>
    %15 = vector.shape_cast %14 : vector<1x8x128xf32> to vector<8x128xf32>
    %16 = arith.addf %15, %13 : vector<8x128xf32>
    %17 = math.tanh %16 : vector<8x128xf32>
    %c1_13 = arith.constant 1 : index
    %c0_14 = arith.constant 0 : index
    %c0_15 = arith.constant 0 : index
    %18 = vector.load %arg4[%c1_13, %c0_14, %c0_15] : memref<8x8x128xf32, #tpu.memory_space<vmem>>, vector<1x8x128xf32>
    %19 = vector.shape_cast %18 : vector<1x8x128xf32> to vector<8x128xf32>
    %20 = vector.shape_cast %17 : vector<8x128xf32> to vector<1x8x128xf32>
    tpu.vector_store %arg4[%c1_13, %c0_14, %c0_15], %20 {strides = array<i32>} : memref<8x8x128xf32, #tpu.memory_space<vmem>>, vector<1x8x128xf32>,
    %cst_16 = arith.constant dense<0.000000e+00> : vector<8x128xf32>
    %21 = tpu.matmul %17, %3, %cst_16 {dimension_numbers = #tpu.dot_dimension_numbers<[1], [0], [0], [1], [0, 0, 1, 1], [], []>} : vector<8x128xf32>, vector<128x128xf32>, vector<8x128xf32> -> vector<8x128xf32>
    %c2 = arith.constant 2 : index
    %c0_17 = arith.constant 0 : index
    %c0_18 = arith.constant 0 : index
    %22 = vector.load %arg2[%c2, %c0_17, %c0_18] : memref<8x8x128xf32, #tpu.memory_space<vmem>>, vector<1x8x128xf32>
    %23 = vector.shape_cast %22 : vector<1x8x128xf32> to vector<8x128xf32>
    %24 = arith.addf %23, %21 : vector<8x128xf32>
    %25 = math.tanh %24 : vector<8x128xf32>
    %c2_19 = arith.constant 2 : index
    %c0_20 = arith.constant 0 : index
    %c0_21 = arith.constant 0 : index
    %26 = vector.load %arg4[%c2_19, %c0_20, %c0_21] : memref<8x8x128xf32, #tpu.memory_space<vmem>>, vector<1x8x128xf32>
    %27 = vector.shape_cast %26 : vector<1x8x128xf32> to vector<8x128xf32>
    %28 = vector.shape_cast %25 : vector<8x128xf32> to vector<1x8x128xf32>
    tpu.vector_store %arg4[%c2_19, %c0_20, %c0_21], %28 {strides = array<i32>} : memref<8x8x128xf32, #tpu.memory_space<vmem>>, vector<1x8x128xf32>,
    %cst_22 = arith.constant dense<0.000000e+00> : vector<8x128xf32>
    %29 = tpu.matmul %25, %3, %cst_22 {dimension_numbers = #tpu.dot_dimension_numbers<[1], [0], [0], [1], [0, 0, 1, 1], [], []>} : vector<8x128xf32>, vector<128x128xf32>, vector<8x128xf32> -> vector<8x128xf32>
    %c3 = arith.constant 3 : index
    %c0_23 = arith.constant 0 : index
    %c0_24 = arith.constant 0 : index
    %30 = vector.load %arg2[%c3, %c0_23, %c0_24] : memref<8x8x128xf32, #tpu.memory_space<vmem>>, vector<1x8x128xf32>
    %31 = vector.shape_cast %30 : vector<1x8x128xf32> to vector<8x128xf32>
    %32 = arith.addf %31, %29 : vector<8x128xf32>
    %33 = math.tanh %32 : vector<8x128xf32>
    %c3_25 = arith.constant 3 : index
    %c0_26 = arith.constant 0 : index
    %c0_27 = arith.constant 0 : index
    %34 = vector.load %arg4[%c3_25, %c0_26, %c0_27] : memref<8x8x128xf32, #tpu.memory_space<vmem>>, vector<1x8x128xf32>
    %35 = vector.shape_cast %34 : vector<1x8x128xf32> to vector<8x128xf32>
    %36 = vector.shape_cast %33 : vector<8x128xf32> to vector<1x8x128xf32>
    tpu.vector_store %arg4[%c3_25, %c0_26, %c0_27], %36 {strides = array<i32>} : memref<8x8x128xf32, #tpu.memory_space<vmem>>, vector<1x8x128xf32>,
    %cst_28 = arith.constant dense<0.000000e+00> : vector<8x128xf32>
    %37 = tpu.matmul %33, %3, %cst_28 {dimension_numbers = #tpu.dot_dimension_numbers<[1], [0], [0], [1], [0, 0, 1, 1], [], []>} : vector<8x128xf32>, vector<128x128xf32>, vector<8x128xf32> -> vector<8x128xf32>
    %c4 = arith.constant 4 : index
    %c0_29 = arith.constant 0 : index
    %c0_30 = arith.constant 0 : index
    %38 = vector.load %arg2[%c4, %c0_29, %c0_30] : memref<8x8x128xf32, #tpu.memory_space<vmem>>, vector<1x8x128xf32>
    %39 = vector.shape_cast %38 : vector<1x8x128xf32> to vector<8x128xf32>
    %40 = arith.addf %39, %37 : vector<8x128xf32>
    %41 = math.tanh %40 : vector<8x128xf32>
    %c4_31 = arith.constant 4 : index
    %c0_32 = arith.constant 0 : index
    %c0_33 = arith.constant 0 : index
    %42 = vector.load %arg4[%c4_31, %c0_32, %c0_33] : memref<8x8x128xf32, #tpu.memory_space<vmem>>, vector<1x8x128xf32>
    %43 = vector.shape_cast %42 : vector<1x8x128xf32> to vector<8x128xf32>
    %44 = vector.shape_cast %41 : vector<8x128xf32> to vector<1x8x128xf32>
    tpu.vector_store %arg4[%c4_31, %c0_32, %c0_33], %44 {strides = array<i32>} : memref<8x8x128xf32, #tpu.memory_space<vmem>>, vector<1x8x128xf32>,
    %cst_34 = arith.constant dense<0.000000e+00> : vector<8x128xf32>
    %45 = tpu.matmul %41, %3, %cst_34 {dimension_numbers = #tpu.dot_dimension_numbers<[1], [0], [0], [1], [0, 0, 1, 1], [], []>} : vector<8x128xf32>, vector<128x128xf32>, vector<8x128xf32> -> vector<8x128xf32>
    %c5 = arith.constant 5 : index
    %c0_35 = arith.constant 0 : index
    %c0_36 = arith.constant 0 : index
    %46 = vector.load %arg2[%c5, %c0_35, %c0_36] : memref<8x8x128xf32, #tpu.memory_space<vmem>>, vector<1x8x128xf32>
    %47 = vector.shape_cast %46 : vector<1x8x128xf32> to vector<8x128xf32>
    %48 = arith.addf %47, %45 : vector<8x128xf32>
    %49 = math.tanh %48 : vector<8x128xf32>
    %c5_37 = arith.constant 5 : index
    %c0_38 = arith.constant 0 : index
    %c0_39 = arith.constant 0 : index
    %50 = vector.load %arg4[%c5_37, %c0_38, %c0_39] : memref<8x8x128xf32, #tpu.memory_space<vmem>>, vector<1x8x128xf32>
    %51 = vector.shape_cast %50 : vector<1x8x128xf32> to vector<8x128xf32>
    %52 = vector.shape_cast %49 : vector<8x128xf32> to vector<1x8x128xf32>
    tpu.vector_store %arg4[%c5_37, %c0_38, %c0_39], %52 {strides = array<i32>} : memref<8x8x128xf32, #tpu.memory_space<vmem>>, vector<1x8x128xf32>,
    %cst_40 = arith.constant dense<0.000000e+00> : vector<8x128xf32>
    %53 = tpu.matmul %49, %3, %cst_40 {dimension_numbers = #tpu.dot_dimension_numbers<[1], [0], [0], [1], [0, 0, 1, 1], [], []>} : vector<8x128xf32>, vector<128x128xf32>, vector<8x128xf32> -> vector<8x128xf32>
    %c6 = arith.constant 6 : index
    %c0_41 = arith.constant 0 : index
    %c0_42 = arith.constant 0 : index
    %54 = vector.load %arg2[%c6, %c0_41, %c0_42] : memref<8x8x128xf32, #tpu.memory_space<vmem>>, vector<1x8x128xf32>
    %55 = vector.shape_cast %54 : vector<1x8x128xf32> to vector<8x128xf32>
    %56 = arith.addf %55, %53 : vector<8x128xf32>
    %57 = math.tanh %56 : vector<8x128xf32>
    %c6_43 = arith.constant 6 : index
    %c0_44 = arith.constant 0 : index
    %c0_45 = arith.constant 0 : index
    %58 = vector.load %arg4[%c6_43, %c0_44, %c0_45] : memref<8x8x128xf32, #tpu.memory_space<vmem>>, vector<1x8x128xf32>
    %59 = vector.shape_cast %58 : vector<1x8x128xf32> to vector<8x128xf32>
    %60 = vector.shape_cast %57 : vector<8x128xf32> to vector<1x8x128xf32>
    tpu.vector_store %arg4[%c6_43, %c0_44, %c0_45], %60 {strides = array<i32>} : memref<8x8x128xf32, #tpu.memory_space<vmem>>, vector<1x8x128xf32>,
    %cst_46 = arith.constant dense<0.000000e+00> : vector<8x128xf32>
    %61 = tpu.matmul %57, %3, %cst_46 {dimension_numbers = #tpu.dot_dimension_numbers<[1], [0], [0], [1], [0, 0, 1, 1], [], []>} : vector<8x128xf32>, vector<128x128xf32>, vector<8x128xf32> -> vector<8x128xf32>
    %c7 = arith.constant 7 : index
    %c0_47 = arith.constant 0 : index
    %c0_48 = arith.constant 0 : index
    %62 = vector.load %arg2[%c7, %c0_47, %c0_48] : memref<8x8x128xf32, #tpu.memory_space<vmem>>, vector<1x8x128xf32>
    %63 = vector.shape_cast %62 : vector<1x8x128xf32> to vector<8x128xf32>
    %64 = arith.addf %63, %61 : vector<8x128xf32>
    %65 = math.tanh %64 : vector<8x128xf32>
    %c7_49 = arith.constant 7 : index
    %c0_50 = arith.constant 0 : index
    %c0_51 = arith.constant 0 : index
    %66 = vector.load %arg4[%c7_49, %c0_50, %c0_51] : memref<8x8x128xf32, #tpu.memory_space<vmem>>, vector<1x8x128xf32>
    %67 = vector.shape_cast %66 : vector<1x8x128xf32> to vector<8x128xf32>
    %68 = vector.shape_cast %65 : vector<8x128xf32> to vector<1x8x128xf32>
    tpu.vector_store %arg4[%c7_49, %c0_50, %c0_51], %68 {strides = array<i32>} : memref<8x8x128xf32, #tpu.memory_space<vmem>>, vector<1x8x128xf32>,
    %c0_52 = arith.constant 0 : index
    %c0_53 = arith.constant 0 : index
    %69 = vector.load %arg5[%c0_52, %c0_53] : memref<8x128xf32, #tpu.memory_space<vmem>>, vector<8x128xf32>
    tpu.vector_store %arg5[%c0_52, %c0_53], %65 {strides = array<i32>} : memref<8x128xf32, #tpu.memory_space<vmem>>, vector<8x128xf32>,
    return
  }
  func.func @transform_0(%arg0: i32, %arg1: i32) -> (i32, i32, i32) {
    %c0_i32 = arith.constant 0 : i32
    %c0_i32_0 = arith.constant 0 : i32
    return %arg1, %arg0, %c0_i32 : i32, i32, i32
  }
  func.func @transform_1(%arg0: i32, %arg1: i32) -> (i32, i32) {
    %c0_i32 = arith.constant 0 : i32
    %c0_i32_0 = arith.constant 0 : i32
    %c0_i32_1 = arith.constant 0 : i32
    return %c0_i32, %c0_i32_0 : i32, i32
  }
  func.func @transform_2(%arg0: i32, %arg1: i32) -> (i32, i32, i32) {
    %c0_i32 = arith.constant 0 : i32
    %c0_i32_0 = arith.constant 0 : i32
    return %arg1, %arg0, %c0_i32 : i32, i32, i32
  }
}

</mosaic_0001>

<bundles_post_ra>
// kernel: tpu_custom_call.1
= control target key start
LH: loop header
LB: loop body
LE: loop exit
PB: predicated region body
PF: predicated region fallthrough
CT: control target
= control target key end

     0   :  { %7 = vsyncpa [#allocation4], 0  ;;  %s1537_s0 = inlined_call_operand.hbm [shape: f32[8,8,128], index: 0, kind: input, shape index: {}]   ;;  %s1538_s1 = inlined_call_operand.hbm [shape: f32[128,128], index: 1, kind: input, shape index: {}]   ;;  %s1539_s2 = inlined_call_operand.hbm [shape: f32[8,8,128], index: 2, kind: output, shape index: {}]  }
   0x1   :  { %8 = vsyncpa [#allocation7], 0 }
   0x2   :  { %9 = vsyncpa [#allocation5], 0  ;;  %s1192_s9 = smov [#allocation3]  }
   0x3   :  { %s15_s10 = sshll.u32 %s1192_s9, 4  ;;  %s16_s10 = int_to_ptr.vmem [resolvable:$true] %s15_s10 }
   0x4   :  { %s1134_s11 = scalar_lea.vmem %s16_s10, 1024  ;;  %p1139_p1 = scmp.lt.s32.totalorder %s16_s10, %s16_s10 }
   0x5   :  { %p1135_p0 = scmp.ne.s32.totalorder %s16_s10, %s1134_s11  ;;  %p1140_p2 = scmp.lt.s32.totalorder %s1134_s11, %s1134_s11 }
   0x7   :  { %p1141_p3 = por %p1140_p2, %p1139_p1 }
   0x9   :  { %p1142_p4 = pnand %p1141_p3, %p1135_p0 }
   0xb   :  { %1145 = shalt.err (!%p1142_p4)
}
   0xc   :  { %s1193_s12 = smov 128   ;;  %s1194_s13 = smov 8  }
   0xd   :  { %21 = dma.hbm_to_vmem [thread:$0]  %s1537_s0, 1024, %s16_s10, [#allocation4], %s1193_s12, %s1193_s12, %s1194_s13  }
   0xe   :  { %s1195_s16 = smov [#allocation6]  }
   0xf   :  { %s27_s17 = sshll.u32 %s1195_s16, 4  ;;  %s28_s17 = int_to_ptr.vmem [resolvable:$true] %s27_s17 }
  0x10   :  { %s1154_s18 = scalar_lea.vmem %s28_s17, 2048  ;;  %p1159_p6 = scmp.lt.s32.totalorder %s28_s17, %s28_s17 }
  0x11   :  { %p1155_p5 = scmp.ne.s32.totalorder %s28_s17, %s1154_s18  ;;  %p1160_p7 = scmp.lt.s32.totalorder %s1154_s18, %s1154_s18 }
  0x13   :  { %p1161_p8 = por %p1160_p7, %p1159_p6 }
  0x15   :  { %p1162_p9 = pnand %p1161_p8, %p1155_p5 }
  0x17   :  { %1165 = shalt.err (!%p1162_p9)
}
  0x18   :  { %33 = dma.hbm_to_vmem [thread:$0]  %s1538_s1, 2048, %s28_s17, [#allocation7], %s1193_s12, %s1193_s12, %s1194_s13  }
  0x19   :  { %1186 = dma.done.wait [#allocation4], 1024  }
  0x1a   :  { %1187 = vsyncadd [#allocation4], 4294966272 }
  0x1b   :  { %1188 = dma.done.wait [#allocation7], 2048  }
  0x1c   :  { %1189 = vsyncadd [#allocation7], 4294965248  ;;  %v1196_v0 = vmov 0.0   ;;  %vm1197_vm0 = vmmov 0   ;;  %v1232_v1 = vld [vmem:[#allocation6 + $0x78] sm:$0xff]  ;;  %v1234_v2 = vld [vmem:[#allocation6 + $0x70] sm:$0xff] }
  0x1d   :  { %823 = vmatprep.subr.mxu0 %v1196_v0  ;;  %855 = vmatprep.mubr.msk.f32.mxu0 %vm1197_vm0, %v1196_v0  ;;  %v1239_v3 = vld [vmem:[#allocation6 + $0x68] sm:$0xff]  ;;  %v1245_v4 = vld [vmem:[#allocation6 + $0x60] sm:$0xff]  ;;  %v1251_v5 = vld [vmem:[#allocation6 + $0x58] sm:$0xff]  ;;  %s1198_s0 = smov [#allocation8]  }
  0x1e   :  { %858 = vmatprep.subr.mxu1 %v1196_v0  ;;  %890 = vmatprep.mubr.msk.f32.mxu1 %vm1197_vm0, %v1196_v0  ;;  %v1257_v6 = vld [vmem:[#allocation6 + $0x50] sm:$0xff]  ;;  %v1263_v7 = vld [vmem:[#allocation6 + $0x48] sm:$0xff]  ;;  %v1269_v8 = vld [vmem:[#allocation6 + $0x40] sm:$0xff]  ;;  %s674_s1 = sshll.u32 %s1198_s0, 4  ;;  %s675_s1 = int_to_ptr.vmem [resolvable:$true] %s674_s1 }
  0x1f   :  { %824 = vmatpush3.msra.mxu0 %v1232_v1  ;;  %859 = vmatpush3.msra.mxu1 %v1232_v1  ;;  %v1275_v9 = vld [vmem:[#allocation6 + $0x38] sm:$0xff]  ;;  %v1281_v10 = vld [vmem:[#allocation6 + $0x30] sm:$0xff]  ;;  %v1287_v11 = vld [vmem:[#allocation6 + $0x28] sm:$0xff]  ;;  %s1166_s21 = scalar_lea.vmem %s675_s1, 1024  ;;  %p1171_p11 = scmp.lt.s32.totalorder %s675_s1, %s675_s1 }
  0x20   :  { %825 = vmatprep.subr.mxu0 %v1196_v0  ;;  %860 = vmatprep.subr.mxu1 %v1196_v0  ;;  %v1293_v12 = vld [vmem:[#allocation6 + $0x20] sm:$0xff]  ;;  %v1299_v13 = vld [vmem:[#allocation6 + $0x18] sm:$0xff]  ;;  %v1305_v14 = vld [vmem:[#allocation6 + $0x10] sm:$0xff]  ;;  %p1167_p10 = scmp.ne.s32.totalorder %s675_s1, %s1166_s21  ;;  %p1172_p12 = scmp.lt.s32.totalorder %s1166_s21, %s1166_s21 }
  0x21   :  { %826 = vmatpush3.msra.mxu0 %v1234_v2  ;;  %861 = vmatpush3.msra.mxu1 %v1234_v2  ;;  %v1311_v15 = vld [vmem:[#allocation6 + $0x8] sm:$0xff]  ;;  %v1317_v16 = vld [vmem:[#allocation6] sm:$0xff]  ;;  %v283_v27 = vld [vmem:[#allocation3 + $0x10] sm:$0xff] }
  0x22   :  { %827 = vmatprep.subr.mxu0 %v1196_v0  ;;  %862 = vmatprep.subr.mxu1 %v1196_v0  ;;  %v132_v17 = vld [vmem:[#allocation3] sm:$0xff]  ;;  %v207_v22 = vld [vmem:[#allocation3 + $0x8] sm:$0xff]  ;;  %v359_v32 = vld [vmem:[#allocation3 + $0x18] sm:$0xff]  ;;  %p1173_p13 = por %p1172_p12, %p1171_p11 }
  0x23   :  { %828 = vmatpush3.msra.mxu0 %v1239_v3  ;;  %863 = vmatpush3.msra.mxu1 %v1239_v3  ;;  %v435_v37 = vld [vmem:[#allocation3 + $0x20] sm:$0xff]  ;;  %v511_v42 = vld [vmem:[#allocation3 + $0x28] sm:$0xff]  ;;  %v587_v47 = vld [vmem:[#allocation3 + $0x30] sm:$0xff] }
  0x24   :  { %829 = vmatprep.subr.mxu0 %v1196_v0  ;;  %864 = vmatprep.subr.mxu1 %v1196_v0  ;;  %v663_v52 = vld [vmem:[#allocation3 + $0x38] sm:$0xff]  ;;  %p1174_p0 = pnand %p1173_p13, %p1167_p10 }
  0x25   :  { %830 = vmatpush3.msra.mxu0 %v1245_v4  ;;  %865 = vmatpush3.msra.mxu1 %v1245_v4 }
  0x26   :  { %831 = vmatprep.subr.mxu0 %v1196_v0  ;;  %866 = vmatprep.subr.mxu1 %v1196_v0 }
  0x27   :  { %832 = vmatpush3.msra.mxu0 %v1251_v5  ;;  %867 = vmatpush3.msra.mxu1 %v1251_v5 }
  0x28   :  { %833 = vmatprep.subr.mxu0 %v1196_v0  ;;  %868 = vmatprep.subr.mxu1 %v1196_v0 }
  0x29   :  { %834 = vmatpush3.msra.mxu0 %v1257_v6  ;;  %869 = vmatpush3.msra.mxu1 %v1257_v6 }
  0x2a   :  { %835 = vmatprep.subr.mxu0 %v1196_v0  ;;  %870 = vmatprep.subr.mxu1 %v1196_v0 }
  0x2b   :  { %836 = vmatpush3.msra.mxu0 %v1263_v7  ;;  %871 = vmatpush3.msra.mxu1 %v1263_v7 }
  0x2c   :  { %837 = vmatprep.subr.mxu0 %v1196_v0  ;;  %872 = vmatprep.subr.mxu1 %v1196_v0 }
  0x2d   :  { %838 = vmatpush3.msra.mxu0 %v1269_v8  ;;  %873 = vmatpush3.msra.mxu1 %v1269_v8 }
  0x2e   :  { %839 = vmatprep.subr.mxu0 %v1196_v0  ;;  %874 = vmatprep.subr.mxu1 %v1196_v0 }
  0x2f   :  { %840 = vmatpush3.msra.mxu0 %v1275_v9  ;;  %875 = vmatpush3.msra.mxu1 %v1275_v9 }
  0x30   :  { %841 = vmatprep.subr.mxu0 %v1196_v0  ;;  %876 = vmatprep.subr.mxu1 %v1196_v0 }
  0x31   :  { %842 = vmatpush3.msra.mxu0 %v1281_v10  ;;  %877 = vmatpush3.msra.mxu1 %v1281_v10 }
  0x32   :  { %843 = vmatprep.subr.mxu0 %v1196_v0  ;;  %878 = vmatprep.subr.mxu1 %v1196_v0 }
  0x33   :  { %844 = vmatpush3.msra.mxu0 %v1287_v11  ;;  %879 = vmatpush3.msra.mxu1 %v1287_v11 }
  0x34   :  { %845 = vmatprep.subr.mxu0 %v1196_v0  ;;  %880 = vmatprep.subr.mxu1 %v1196_v0 }
  0x35   :  { %846 = vmatpush3.msra.mxu0 %v1293_v12  ;;  %881 = vmatpush3.msra.mxu1 %v1293_v12 }
  0x36   :  { %847 = vmatprep.subr.mxu0 %v1196_v0  ;;  %882 = vmatprep.subr.mxu1 %v1196_v0 }
  0x37   :  { %848 = vmatpush3.msra.mxu0 %v1299_v13  ;;  %883 = vmatpush3.msra.mxu1 %v1299_v13 }
  0x38   :  { %849 = vmatprep.subr.mxu0 %v1196_v0  ;;  %884 = vmatprep.subr.mxu1 %v1196_v0 }
  0x39   :  { %850 = vmatpush3.msra.mxu0 %v1305_v14  ;;  %885 = vmatpush3.msra.mxu1 %v1305_v14 }
  0x3a   :  { %851 = vmatprep.subr.mxu0 %v1196_v0  ;;  %886 = vmatprep.subr.mxu1 %v1196_v0 }
  0x3b   :  { %852 = vmatpush3.msra.mxu0 %v1311_v15  ;;  %887 = vmatpush3.msra.mxu1 %v1311_v15 }
  0x3c   :  { %853 = vmatprep.subr.mxu0 %v1196_v0  ;;  %888 = vmatprep.subr.mxu1 %v1196_v0 }
  0x3d   :  { %854 = vmatpush3.msra.mxu0 %v1317_v16  ;;  %889 = vmatpush3.msra.mxu1 %v1317_v16 }
  0x3e   :  { %856 = vmatmul.mubr.f32.vlgmr.msra.gmra.mxu0 %v1196_v0  ;;  %893 = vmatprep.subr.mxu0 %v1196_v0 }
  0x3f   :  { %894 = vmatpush3.msra.mxu0 %v1232_v1  ;;  %925 = vmatprep.mubr.msk.f32.mxu0 %vm1197_vm0, %v1196_v0 }
  0x40   :  { %895 = vmatprep.subr.mxu0 %v1196_v0  ;;  %928 = vmatprep.subr.mxu1 %v1196_v0 }
  0x41   :  { %896 = vmatpush3.msra.mxu0 %v1234_v2 }
  0x42   :  { %897 = vmatprep.subr.mxu0 %v1196_v0 }
  0x43   :  { %898 = vmatpush3.msra.mxu0 %v1239_v3 }
  0x44   :  { %899 = vmatprep.subr.mxu0 %v1196_v0 }
  0x45   :  { %900 = vmatpush3.msra.mxu0 %v1245_v4 }
  0x46   :  { %901 = vmatprep.subr.mxu0 %v1196_v0 }
  0x47   :  { %902 = vmatpush3.msra.mxu0 %v1251_v5 }
  0x48   :  { %903 = vmatprep.subr.mxu0 %v1196_v0 }
  0x49   :  { %904 = vmatpush3.msra.mxu0 %v1257_v6 }
  0x4a   :  { %905 = vmatprep.subr.mxu0 %v1196_v0 }
  0x4b   :  { %906 = vmatpush3.msra.mxu0 %v1263_v7 }
  0x4c   :  { %907 = vmatprep.subr.mxu0 %v1196_v0 }
  0x4d   :  { %908 = vmatpush3.msra.mxu0 %v1269_v8 }
  0x4e   :  { %909 = vmatprep.subr.mxu0 %v1196_v0 }
  0x4f   :  { %910 = vmatpush3.msra.mxu0 %v1275_v9 }
  0x50   :  { %911 = vmatprep.subr.mxu0 %v1196_v0 }
  0x51   :  { %912 = vmatpush3.msra.mxu0 %v1281_v10 }
  0x52   :  { %913 = vmatprep.subr.mxu0 %v1196_v0 }
  0x53   :  { %914 = vmatpush3.msra.mxu0 %v1287_v11 }
  0x54   :  { %915 = vmatprep.subr.mxu0 %v1196_v0 }
  0x55   :  { %916 = vmatpush3.msra.mxu0 %v1293_v12 }
  0x56   :  { %917 = vmatprep.subr.mxu0 %v1196_v0 }
  0x57   :  { %918 = vmatpush3.msra.mxu0 %v1299_v13 }
  0x58   :  { %919 = vmatprep.subr.mxu0 %v1196_v0 }
  0x59   :  { %920 = vmatpush3.msra.mxu0 %v1305_v14 }
  0x5a   :  { %921 = vmatprep.subr.mxu0 %v1196_v0 }
  0x5b   :  { %922 = vmatpush3.msra.mxu0 %v1311_v15 }
  0x5c   :  { %923 = vmatprep.subr.mxu0 %v1196_v0 }
  0x5d   :  { %924 = vmatpush3.msra.mxu0 %v1317_v16 }
  0x5e   :  { %963 = vmatprep.subr.mxu0 %v1196_v0 }
  0xfe   :  { %v128_v18 = vpop.f32.mrf.mxu0 }
  0xff   :  { %v133_v19 = vadd.f32 %v132_v17, %v128_v18 }
 0x100   :  { %v857_v20 = vpop.f32.mrf.mxu0 }
 0x101   :  { %1110 = vtanh.f32 %v133_v19 }
 0x10e   :  { %v1111_v21 = vpop.eup %1110 }
 0x10f   :  { %135 = vst [vmem:[#allocation8] sm:$0xff] %v1111_v21  ;;  %891 = vmatmul.mubr.f32.vlgmr.msra.gmra.mxu1 %v1111_v21 }
 0x110   :  { %929 = vmatpush3.msra.mxu1 %v1232_v1  ;;  %960 = vmatprep.mubr.msk.f32.mxu1 %vm1197_vm0, %v1196_v0 }
 0x111   :  { %930 = vmatprep.subr.mxu1 %v1196_v0 }
 0x112   :  { %931 = vmatpush3.msra.mxu1 %v1234_v2 }
 0x113   :  { %932 = vmatprep.subr.mxu1 %v1196_v0 }
 0x114   :  { %933 = vmatpush3.msra.mxu1 %v1239_v3 }
 0x115   :  { %934 = vmatprep.subr.mxu1 %v1196_v0 }
 0x116   :  { %935 = vmatpush3.msra.mxu1 %v1245_v4 }
 0x117   :  { %936 = vmatprep.subr.mxu1 %v1196_v0 }
 0x118   :  { %937 = vmatpush3.msra.mxu1 %v1251_v5 }
 0x119   :  { %938 = vmatprep.subr.mxu1 %v1196_v0 }
 0x11a   :  { %939 = vmatpush3.msra.mxu1 %v1257_v6 }
 0x11b   :  { %940 = vmatprep.subr.mxu1 %v1196_v0 }
 0x11c   :  { %941 = vmatpush3.msra.mxu1 %v1263_v7 }
 0x11d   :  { %942 = vmatprep.subr.mxu1 %v1196_v0 }
 0x11e   :  { %943 = vmatpush3.msra.mxu1 %v1269_v8 }
 0x11f   :  { %944 = vmatprep.subr.mxu1 %v1196_v0 }
 0x120   :  { %945 = vmatpush3.msra.mxu1 %v1275_v9 }
 0x121   :  { %946 = vmatprep.subr.mxu1 %v1196_v0 }
 0x122   :  { %947 = vmatpush3.msra.mxu1 %v1281_v10 }
 0x123   :  { %948 = vmatprep.subr.mxu1 %v1196_v0 }
 0x124   :  { %949 = vmatpush3.msra.mxu1 %v1287_v11 }
 0x125   :  { %950 = vmatprep.subr.mxu1 %v1196_v0 }
 0x126   :  { %951 = vmatpush3.msra.mxu1 %v1293_v12 }
 0x127   :  { %952 = vmatprep.subr.mxu1 %v1196_v0 }
 0x128   :  { %953 = vmatpush3.msra.mxu1 %v1299_v13 }
 0x129   :  { %954 = vmatprep.subr.mxu1 %v1196_v0 }
 0x12a   :  { %955 = vmatpush3.msra.mxu1 %v1305_v14 }
 0x12b   :  { %956 = vmatprep.subr.mxu1 %v1196_v0 }
 0x12c   :  { %957 = vmatpush3.msra.mxu1 %v1311_v15 }
 0x12d   :  { %958 = vmatprep.subr.mxu1 %v1196_v0 }
 0x12e   :  { %959 = vmatpush3.msra.mxu1 %v1317_v16 }
 0x12f   :  { %998 = vmatprep.subr.mxu1 %v1196_v0 }
 0x1cf   :  { %v202_v23 = vpop.f32.mrf.mxu1 }
 0x1d0   :  { %v208_v24 = vadd.f32 %v207_v22, %v202_v23 }
 0x1d1   :  { %v892_v25 = vpop.f32.mrf.mxu1 }
 0x1d2   :  { %1112 = vtanh.f32 %v208_v24 }
 0x1df   :  { %v1113_v26 = vpop.eup %1112 }
 0x1e0   :  { %211 = vst [vmem:[#allocation8 + $0x8] sm:$0xff] %v1113_v26  ;;  %926 = vmatmul.mubr.f32.vlgmr.msra.gmra.mxu0 %v1113_v26 }
 0x1e1   :  { %964 = vmatpush3.msra.mxu0 %v1232_v1  ;;  %995 = vmatprep.mubr.msk.f32.mxu0 %vm1197_vm0, %v1196_v0 }
 0x1e2   :  { %965 = vmatprep.subr.mxu0 %v1196_v0 }
 0x1e3   :  { %966 = vmatpush3.msra.mxu0 %v1234_v2 }
 0x1e4   :  { %967 = vmatprep.subr.mxu0 %v1196_v0 }
 0x1e5   :  { %968 = vmatpush3.msra.mxu0 %v1239_v3 }
 0x1e6   :  { %969 = vmatprep.subr.mxu0 %v1196_v0 }
 0x1e7   :  { %970 = vmatpush3.msra.mxu0 %v1245_v4 }
 0x1e8   :  { %971 = vmatprep.subr.mxu0 %v1196_v0 }
 0x1e9   :  { %972 = vmatpush3.msra.mxu0 %v1251_v5 }
 0x1ea   :  { %973 = vmatprep.subr.mxu0 %v1196_v0 }
 0x1eb   :  { %974 = vmatpush3.msra.mxu0 %v1257_v6 }
 0x1ec   :  { %975 = vmatprep.subr.mxu0 %v1196_v0 }
 0x1ed   :  { %976 = vmatpush3.msra.mxu0 %v1263_v7 }
 0x1ee   :  { %977 = vmatprep.subr.mxu0 %v1196_v0 }
 0x1ef   :  { %978 = vmatpush3.msra.mxu0 %v1269_v8 }
 0x1f0   :  { %979 = vmatprep.subr.mxu0 %v1196_v0 }
 0x1f1   :  { %980 = vmatpush3.msra.mxu0 %v1275_v9 }
 0x1f2   :  { %981 = vmatprep.subr.mxu0 %v1196_v0 }
 0x1f3   :  { %982 = vmatpush3.msra.mxu0 %v1281_v10 }
 0x1f4   :  { %983 = vmatprep.subr.mxu0 %v1196_v0 }
 0x1f5   :  { %984 = vmatpush3.msra.mxu0 %v1287_v11 }
 0x1f6   :  { %985 = vmatprep.subr.mxu0 %v1196_v0 }
 0x1f7   :  { %986 = vmatpush3.msra.mxu0 %v1293_v12 }
 0x1f8   :  { %987 = vmatprep.subr.mxu0 %v1196_v0 }
 0x1f9   :  { %988 = vmatpush3.msra.mxu0 %v1299_v13 }
 0x1fa   :  { %989 = vmatprep.subr.mxu0 %v1196_v0 }
 0x1fb   :  { %990 = vmatpush3.msra.mxu0 %v1305_v14 }
 0x1fc   :  { %991 = vmatprep.subr.mxu0 %v1196_v0 }
 0x1fd   :  { %992 = vmatpush3.msra.mxu0 %v1311_v15 }
 0x1fe   :  { %993 = vmatprep.subr.mxu0 %v1196_v0 }
 0x1ff   :  { %994 = vmatpush3.msra.mxu0 %v1317_v16 }
 0x200   :  { %1033 = vmatprep.subr.mxu0 %v1196_v0 }
 0x2a0   :  { %v278_v28 = vpop.f32.mrf.mxu0 }
 0x2a1   :  { %v284_v29 = vadd.f32 %v283_v27, %v278_v28 }
 0x2a2   :  { %v927_v30 = vpop.f32.mrf.mxu0 }
 0x2a3   :  { %1114 = vtanh.f32 %v284_v29 }
 0x2b0   :  { %v1115_v31 = vpop.eup %1114 }
 0x2b1   :  { %287 = vst [vmem:[#allocation8 + $0x10] sm:$0xff] %v1115_v31  ;;  %961 = vmatmul.mubr.f32.vlgmr.msra.gmra.mxu1 %v1115_v31 }
 0x2b2   :  { %999 = vmatpush3.msra.mxu1 %v1232_v1  ;;  %1030 = vmatprep.mubr.msk.f32.mxu1 %vm1197_vm0, %v1196_v0 }
 0x2b3   :  { %1000 = vmatprep.subr.mxu1 %v1196_v0 }
 0x2b4   :  { %1001 = vmatpush3.msra.mxu1 %v1234_v2 }
 0x2b5   :  { %1002 = vmatprep.subr.mxu1 %v1196_v0 }
 0x2b6   :  { %1003 = vmatpush3.msra.mxu1 %v1239_v3 }
 0x2b7   :  { %1004 = vmatprep.subr.mxu1 %v1196_v0 }
 0x2b8   :  { %1005 = vmatpush3.msra.mxu1 %v1245_v4 }
 0x2b9   :  { %1006 = vmatprep.subr.mxu1 %v1196_v0 }
 0x2ba   :  { %1007 = vmatpush3.msra.mxu1 %v1251_v5 }
 0x2bb   :  { %1008 = vmatprep.subr.mxu1 %v1196_v0 }
 0x2bc   :  { %1009 = vmatpush3.msra.mxu1 %v1257_v6 }
 0x2bd   :  { %1010 = vmatprep.subr.mxu1 %v1196_v0 }
 0x2be   :  { %1011 = vmatpush3.msra.mxu1 %v1263_v7 }
 0x2bf   :  { %1012 = vmatprep.subr.mxu1 %v1196_v0 }
 0x2c0   :  { %1013 = vmatpush3.msra.mxu1 %v1269_v8 }
 0x2c1   :  { %1014 = vmatprep.subr.mxu1 %v1196_v0 }
 0x2c2   :  { %1015 = vmatpush3.msra.mxu1 %v1275_v9 }
 0x2c3   :  { %1016 = vmatprep.subr.mxu1 %v1196_v0 }
 0x2c4   :  { %1017 = vmatpush3.msra.mxu1 %v1281_v10 }
 0x2c5   :  { %1018 = vmatprep.subr.mxu1 %v1196_v0 }
 0x2c6   :  { %1019 = vmatpush3.msra.mxu1 %v1287_v11 }
 0x2c7   :  { %1020 = vmatprep.subr.mxu1 %v1196_v0 }
 0x2c8   :  { %1021 = vmatpush3.msra.mxu1 %v1293_v12 }
 0x2c9   :  { %1022 = vmatprep.subr.mxu1 %v1196_v0 }
 0x2ca   :  { %1023 = vmatpush3.msra.mxu1 %v1299_v13 }
 0x2cb   :  { %1024 = vmatprep.subr.mxu1 %v1196_v0 }
 0x2cc   :  { %1025 = vmatpush3.msra.mxu1 %v1305_v14 }
 0x2cd   :  { %1026 = vmatprep.subr.mxu1 %v1196_v0 }
 0x2ce   :  { %1027 = vmatpush3.msra.mxu1 %v1311_v15 }
 0x2cf   :  { %1028 = vmatprep.subr.mxu1 %v1196_v0 }
 0x2d0   :  { %1029 = vmatpush3.msra.mxu1 %v1317_v16 }
 0x2d1   :  { %1068 = vmatprep.subr.mxu1 %v1196_v0 }
 0x371   :  { %v354_v33 = vpop.f32.mrf.mxu1 }
 0x372   :  { %v360_v34 = vadd.f32 %v359_v32, %v354_v33 }
 0x373   :  { %v962_v35 = vpop.f32.mrf.mxu1 }
 0x374   :  { %1116 = vtanh.f32 %v360_v34 }
 0x381   :  { %v1117_v36 = vpop.eup %1116 }
 0x382   :  { %363 = vst [vmem:[#allocation8 + $0x18] sm:$0xff] %v1117_v36  ;;  %996 = vmatmul.mubr.f32.vlgmr.msra.gmra.mxu0 %v1117_v36 }
 0x383   :  { %1034 = vmatpush3.msra.mxu0 %v1232_v1  ;;  %1065 = vmatprep.mubr.msk.f32.mxu0 %vm1197_vm0, %v1196_v0 }
 0x384   :  { %1035 = vmatprep.subr.mxu0 %v1196_v0 }
 0x385   :  { %1036 = vmatpush3.msra.mxu0 %v1234_v2 }
 0x386   :  { %1037 = vmatprep.subr.mxu0 %v1196_v0 }
 0x387   :  { %1038 = vmatpush3.msra.mxu0 %v1239_v3 }
 0x388   :  { %1039 = vmatprep.subr.mxu0 %v1196_v0 }
 0x389   :  { %1040 = vmatpush3.msra.mxu0 %v1245_v4 }
 0x38a   :  { %1041 = vmatprep.subr.mxu0 %v1196_v0 }
 0x38b   :  { %1042 = vmatpush3.msra.mxu0 %v1251_v5 }
 0x38c   :  { %1043 = vmatprep.subr.mxu0 %v1196_v0 }
 0x38d   :  { %1044 = vmatpush3.msra.mxu0 %v1257_v6 }
 0x38e   :  { %1045 = vmatprep.subr.mxu0 %v1196_v0 }
 0x38f   :  { %1046 = vmatpush3.msra.mxu0 %v1263_v7 }
 0x390   :  { %1047 = vmatprep.subr.mxu0 %v1196_v0 }
 0x391   :  { %1048 = vmatpush3.msra.mxu0 %v1269_v8 }
 0x392   :  { %1049 = vmatprep.subr.mxu0 %v1196_v0 }
 0x393   :  { %1050 = vmatpush3.msra.mxu0 %v1275_v9 }
 0x394   :  { %1051 = vmatprep.subr.mxu0 %v1196_v0 }
 0x395   :  { %1052 = vmatpush3.msra.mxu0 %v1281_v10 }
 0x396   :  { %1053 = vmatprep.subr.mxu0 %v1196_v0 }
 0x397   :  { %1054 = vmatpush3.msra.mxu0 %v1287_v11 }
 0x398   :  { %1055 = vmatprep.subr.mxu0 %v1196_v0 }
 0x399   :  { %1056 = vmatpush3.msra.mxu0 %v1293_v12 }
 0x39a   :  { %1057 = vmatprep.subr.mxu0 %v1196_v0 }
 0x39b   :  { %1058 = vmatpush3.msra.mxu0 %v1299_v13 }
 0x39c   :  { %1059 = vmatprep.subr.mxu0 %v1196_v0 }
 0x39d   :  { %1060 = vmatpush3.msra.mxu0 %v1305_v14 }
 0x39e   :  { %1061 = vmatprep.subr.mxu0 %v1196_v0 }
 0x39f   :  { %1062 = vmatpush3.msra.mxu0 %v1311_v15 }
 0x3a0   :  { %1063 = vmatprep.subr.mxu0 %v1196_v0 }
 0x3a1   :  { %1064 = vmatpush3.msra.mxu0 %v1317_v16 }
 0x442   :  { %v430_v38 = vpop.f32.mrf.mxu0 }
 0x443   :  { %v436_v39 = vadd.f32 %v435_v37, %v430_v38 }
 0x444   :  { %v997_v40 = vpop.f32.mrf.mxu0 }
 0x445   :  { %1118 = vtanh.f32 %v436_v39 }
 0x452   :  { %v1119_v41 = vpop.eup %1118 }
 0x453   :  { %439 = vst [vmem:[#allocation8 + $0x20] sm:$0xff] %v1119_v41  ;;  %1031 = vmatmul.mubr.f32.vlgmr.msra.gmra.mxu1 %v1119_v41 }
 0x454   :  { %1069 = vmatpush3.msra.mxu1 %v1232_v1  ;;  %1100 = vmatprep.mubr.msk.f32.mxu1 %vm1197_vm0, %v1196_v0 }
 0x455   :  { %1070 = vmatprep.subr.mxu1 %v1196_v0 }
 0x456   :  { %1071 = vmatpush3.msra.mxu1 %v1234_v2 }
 0x457   :  { %1072 = vmatprep.subr.mxu1 %v1196_v0 }
 0x458   :  { %1073 = vmatpush3.msra.mxu1 %v1239_v3 }
 0x459   :  { %1074 = vmatprep.subr.mxu1 %v1196_v0 }
 0x45a   :  { %1075 = vmatpush3.msra.mxu1 %v1245_v4 }
 0x45b   :  { %1076 = vmatprep.subr.mxu1 %v1196_v0 }
 0x45c   :  { %1077 = vmatpush3.msra.mxu1 %v1251_v5 }
 0x45d   :  { %1078 = vmatprep.subr.mxu1 %v1196_v0 }
 0x45e   :  { %1079 = vmatpush3.msra.mxu1 %v1257_v6 }
 0x45f   :  { %1080 = vmatprep.subr.mxu1 %v1196_v0 }
 0x460   :  { %1081 = vmatpush3.msra.mxu1 %v1263_v7 }
 0x461   :  { %1082 = vmatprep.subr.mxu1 %v1196_v0 }
 0x462   :  { %1083 = vmatpush3.msra.mxu1 %v1269_v8 }
 0x463   :  { %1084 = vmatprep.subr.mxu1 %v1196_v0 }
 0x464   :  { %1085 = vmatpush3.msra.mxu1 %v1275_v9 }
 0x465   :  { %1086 = vmatprep.subr.mxu1 %v1196_v0 }
 0x466   :  { %1087 = vmatpush3.msra.mxu1 %v1281_v10 }
 0x467   :  { %1088 = vmatprep.subr.mxu1 %v1196_v0 }
 0x468   :  { %1089 = vmatpush3.msra.mxu1 %v1287_v11 }
 0x469   :  { %1090 = vmatprep.subr.mxu1 %v1196_v0 }
 0x46a   :  { %1091 = vmatpush3.msra.mxu1 %v1293_v12 }
 0x46b   :  { %1092 = vmatprep.subr.mxu1 %v1196_v0 }
 0x46c   :  { %1093 = vmatpush3.msra.mxu1 %v1299_v13 }
 0x46d   :  { %1094 = vmatprep.subr.mxu1 %v1196_v0 }
 0x46e   :  { %1095 = vmatpush3.msra.mxu1 %v1305_v14 }
 0x46f   :  { %1096 = vmatprep.subr.mxu1 %v1196_v0 }
 0x470   :  { %1097 = vmatpush3.msra.mxu1 %v1311_v15 }
 0x471   :  { %1098 = vmatprep.subr.mxu1 %v1196_v0 }
 0x472   :  { %1099 = vmatpush3.msra.mxu1 %v1317_v16 }
 0x513   :  { %v506_v43 = vpop.f32.mrf.mxu1 }
 0x514   :  { %v512_v44 = vadd.f32 %v511_v42, %v506_v43 }
 0x515   :  { %v1032_v45 = vpop.f32.mrf.mxu1 }
 0x516   :  { %1120 = vtanh.f32 %v512_v44 }
 0x523   :  { %v1121_v46 = vpop.eup %1120 }
 0x524   :  { %515 = vst [vmem:[#allocation8 + $0x28] sm:$0xff] %v1121_v46  ;;  %1066 = vmatmul.mubr.f32.vlgmr.msra.gmra.mxu0 %v1121_v46 }
 0x5e4   :  { %v582_v48 = vpop.f32.mrf.mxu0 }
 0x5e5   :  { %v588_v49 = vadd.f32 %v587_v47, %v582_v48 }
 0x5e6   :  { %v1067_v50 = vpop.f32.mrf.mxu0 }
 0x5e7   :  { %1122 = vtanh.f32 %v588_v49 }
 0x5f4   :  { %v1123_v51 = vpop.eup %1122 }
 0x5f5   :  { %591 = vst [vmem:[#allocation8 + $0x30] sm:$0xff] %v1123_v51  ;;  %1101 = vmatmul.mubr.f32.vlgmr.msra.gmra.mxu1 %v1123_v51 }
 0x6b5   :  { %v658_v53 = vpop.f32.mrf.mxu1 }
 0x6b6   :  { %v664_v54 = vadd.f32 %v663_v52, %v658_v53 }
 0x6b7   :  { %v1102_v55 = vpop.f32.mrf.mxu1 }
 0x6b8   :  { %1124 = vtanh.f32 %v664_v54 }
 0x6c5   :  { %v1125_v56 = vpop.eup %1124 }
 0x6c6   :  { %667 = vst [vmem:[#allocation8 + $0x38] sm:$0xff] %v1125_v56 }
 0x6c7   :  { %1177 = shalt.err (!%p1174_p0)
}
 0x6c8   :  { %680 = dma.vmem_to_hbm [thread:$0]  %s675_s1, 1024, %s1539_s2, [#allocation5], %s1193_s12, %s1193_s12, %s1194_s13  }
 0x6c9   :  { %1190 = dma.done.wait [#allocation5], 1024  }
 0x6ca   :  { %1191 = vsyncadd [#allocation5], 4294966272 }
 0x6cb   :  { %684 = vsyncpa [#allocation4], 1 }
 0x6cc   :  { %685 = vsyncpa [#allocation7], 1 }
 0x6cd   :  { %686 = vsyncpa [#allocation5], 1 }

</bundles_post_ra>
